<compile_context>
chip_gen: v6e
topology: v6e:2x2x1
jax: 0.10.0
libtpu: 0.0.40
codegen_flags: <defaults>
</compile_context>

<pallas_src>
import jax
import jax.numpy as jnp
from jax.experimental import pallas as pl
from jax.experimental.pallas import tpu as pltpu

LEAKY_RATE = 0.1
_MIB = 1024 * 1024


def _round_up(v, m):
    return (v + m - 1) // m * m


def _cdiv(a, b):
    return (a + b - 1) // b


def _sublane(itemsize):
    # Sublane tile height for a dtype (f32: 8, bf16: 16, int8: 32).
    return 8 * max(1, 4 // itemsize)


def _vmem_capacity_bytes():
    try:
        return int(pltpu.get_tpu_info().vmem_capacity_bytes)
    except Exception:
        return 64 * _MIB  # conservative (v7x-sized); only used to pick budgets


def _choose_tile_l(cin, cout, in_sz, out_sz, *, vmem_budget_bytes,
                   target_x_tile_bytes=2 * _MIB, length_cap=None):
    """Pick a lane-tile width (multiple of 128).

    Returns (tl, vmem_need_bytes).  The estimate accounts for the
    double-buffered x / y tiles AND the double-buffered weight + bias
    (Pallas double-buffers every input spec, even constant-index ones).
    """
    cin_p = _round_up(cin, _sublane(in_sz))
    cout_p = _round_up(cout, _sublane(out_sz))
    per_lane = 2 * (cin_p * in_sz + cout_p * out_sz)          # x + y, 2 bufs
    w_bytes = 2 * _round_up(cout, _sublane(in_sz)) * _round_up(cin, 128) * in_sz
    b_bytes = 2 * _round_up(cout, 8) * 128 * 4
    avail = max(vmem_budget_bytes - w_bytes - b_bytes, per_lane * 128)
    fit = max(128, (avail // per_lane) // 128 * 128)
    # Channel-aware cap: aim for a multi-MiB x tile so the ~0.35us per-step
    # overhead is amortized even with small channel counts.
    want = max(1024, target_x_tile_bytes // max(1, cin_p * in_sz))
    want = max(128, want // 128 * 128)
    tl = min(fit, want)
    if length_cap is not None:
        tl = min(tl, max(128, length_cap))
    tl = max(128, tl)
    need = 2 * tl * (cin_p * in_sz + cout_p * out_sz) + w_bytes + b_bytes
    return tl, need


def _ensure_two_blocks(extent, tl):
    """Split a single-block axis into >= 2 blocks so both v7x TCs get work."""
    if _cdiv(extent, tl) >= 2 or extent <= 128:
        return tl
    return max(128, _round_up(_cdiv(extent, 2), 128))


def _conv1d_kernel(x_ref, w_ref, b_ref, o_ref):
    # x_ref: (Cin, TL)  w_ref: (Cout, Cin)  b_ref: (Cout, 1)  o_ref: (Cout, TL)
    y = jnp.dot(w_ref[...], x_ref[...], preferred_element_type=jnp.float32)
    y = y + b_ref[...]                       # bias is already f32
    y = jnp.maximum(y, LEAKY_RATE * y)       # LeakyReLU(0.1), f32 epilogue
    o_ref[...] = y.astype(o_ref.dtype)


def _xla_fallback(x, weight, bias, out_dtype):
    y = jnp.einsum("oc,ncl->nol", weight[:, :, 0].astype(jnp.float32),
                   x.astype(jnp.float32)) + bias.astype(jnp.float32)[None, :, None]
    y = jnp.maximum(y, LEAKY_RATE * y)
    return y.astype(out_dtype)


def conv1d_forward(x, weight, bias, *, compute_dtype=None, out_dtype=None,
                   min_pallas_elements=65536):
    """Conv1d(kernel_size=1) + bias + LeakyReLU(0.1).

    x: (N, Cin, L); weight: (Cout, Cin, 1); bias: (Cout,) -> (N, Cout, L).
    """
    N, Cin, L = x.shape
    Cout = weight.shape[0]
    assert weight.shape[-1] == 1, "only kernel_size=1 is implemented"
    compute_dtype = compute_dtype or x.dtype
    out_dtype = out_dtype or x.dtype

    # Tiny problems: fused XLA beats kernel launch + (8,128) padding overhead.
    if N * L * max(Cin, Cout) < min_pallas_elements:
        return _xla_fallback(x, weight, bias, out_dtype)

    w2d = weight.reshape(Cout, Cin).astype(compute_dtype)
    b2d = bias.reshape(Cout, 1).astype(jnp.float32)   # epilogue stays f32

    in_sz = jnp.dtype(compute_dtype).itemsize
    out_sz = jnp.dtype(out_dtype).itemsize

    vmem_cap = _vmem_capacity_bytes()
    if vmem_cap <= 64 * _MIB:            # v7x-class: 64 MiB physical VMEM
        tile_budget, limit_cap = 22 * _MIB, 40 * _MIB
    else:                                # v5e/v6e-class: 128 MiB VMEM
        tile_budget, limit_cap = 40 * _MIB, 64 * _MIB

    # Fold the batch into the lane axis when L is small: fat lane-dense tiles
    # instead of one narrow (<512 lane) tile per batch element.
    fold = (L < 128) or (N > 1 and L < 512)

    if not fold:
        # Path A: tile the length (lane) axis; grid over (batch, length tiles).
        # No padding of x and no output slice: the last tile is ragged and its
        # output write is masked by Pallas (the garbage input columns only feed
        # trap-free ops and are discarded).
        length_cap = max(128, (L // 128) * 128)
        tl, need = _choose_tile_l(Cin, Cout, in_sz, out_sz,
                                  vmem_budget_bytes=tile_budget,
                                  length_cap=length_cap)
        if N == 1:
            tl = _ensure_two_blocks(L, tl)
        grid = (N, _cdiv(L, tl))
        in_specs = [
            pl.BlockSpec((None, Cin, tl), lambda n, l: (n, 0, l)),
            pl.BlockSpec((Cout, Cin), lambda n, l: (0, 0)),
            pl.BlockSpec((Cout, 1), lambda n, l: (0, 0)),
        ]
        out_specs = pl.BlockSpec((None, Cout, tl), lambda n, l: (n, 0, l))
        out_shape = jax.ShapeDtypeStruct((N, Cout, L), out_dtype)
        dim_sem = ("parallel", "parallel")
        xk = x.astype(compute_dtype)
    else:
        # Path B: fold batch into lanes for a lane-dense output.
        M = N * L
        M_pad = _round_up(M, 128)
        xk = jnp.transpose(x, (1, 0, 2)).reshape(Cin, M).astype(compute_dtype)
        if M_pad != M:
            xk = jnp.pad(xk, ((0, 0), (0, M_pad - M)))
        tl, need = _choose_tile_l(Cin, Cout, in_sz, out_sz,
                                  vmem_budget_bytes=tile_budget,
                                  length_cap=M_pad)
        tl = _ensure_two_blocks(M_pad, tl)
        grid = (_cdiv(M_pad, tl),)
        in_specs = [
            pl.BlockSpec((Cin, tl), lambda l: (0, l)),
            pl.BlockSpec((Cout, Cin), lambda l: (0, 0)),
            pl.BlockSpec((Cout, 1), lambda l: (0, 0)),
        ]
        out_specs = pl.BlockSpec((Cout, tl), lambda l: (0, l))
        out_shape = jax.ShapeDtypeStruct((Cout, M_pad), out_dtype)
        dim_sem = ("parallel",)

    vmem_limit = int(min(limit_cap, max(32 * _MIB, need * 5 // 4)))

    yk = pl.pallas_call(
        _conv1d_kernel,
        out_shape=out_shape,
        grid_spec=pltpu.PrefetchScalarGridSpec(
            num_scalar_prefetch=0,
            grid=grid,
            in_specs=in_specs,
            out_specs=out_specs,
        ),
        compiler_params=pltpu.CompilerParams(
            dimension_semantics=dim_sem,
            vmem_limit_bytes=vmem_limit,
        ),
    )(xk, w2d, b2d)

    if not fold:
        return yk
    M = N * L
    y = yk[:, :M] if yk.shape[1] != M else yk
    return jnp.transpose(y.reshape(Cout, N, L), (1, 0, 2))


if __name__ == "__main__":
    key = jax.random.PRNGKey(0)
    kx, kw, kb, kx2, kx3 = jax.random.split(key, 5)

    # Small shapes consistent with the module: batch=2, Cin=4, Cout=8, L=16.
    N, Cin, Cout, L = 2, 4, 8, 16
    x = jax.random.normal(kx, (N, Cin, L), dtype=jnp.float32)
    bound = 1.0 / jnp.sqrt(Cin * 1.0)
    weight = jax.random.uniform(kw, (Cout, Cin, 1), minval=-bound, maxval=bound,
                                dtype=jnp.float32)
    bias = jax.random.uniform(kb, (Cout,), minval=-bound, maxval=bound,
                              dtype=jnp.float32)

    def ref_fn(xv):
        r = jnp.einsum("oc,ncl->nol", weight[:, :, 0], xv) + bias[None, :, None]
        return jnp.where(r > 0, r, LEAKY_RATE * r)

    # 1) Tiny shape with defaults -> fused-XLA small-problem bailout.
    out = jax.block_until_ready(conv1d_forward(x, weight, bias))
    assert out.shape == (N, Cout, L)
    assert jnp.allclose(out, ref_fn(x), atol=1e-5, rtol=1e-5)

    # 2) Same tiny shape, force the Pallas batch-folded (Path B) kernel.
    out_b = jax.block_until_ready(
        conv1d_forward(x, weight, bias, min_pallas_elements=0))
    assert out_b.shape == (N, Cout, L)
    assert jnp.allclose(out_b, ref_fn(x), atol=1e-5, rtol=1e-5)

    # 3) Length-tiled Path A with a ragged (masked) last tile: L=600.
    L2 = 600
    x2 = jax.random.normal(kx2, (N, Cin, L2), dtype=jnp.float32)
    out2 = jax.block_until_ready(
        conv1d_forward(x2, weight, bias, min_pallas_elements=0))
    assert out2.shape == (N, Cout, L2)
    assert jnp.allclose(out2, ref_fn(x2), atol=1e-5, rtol=1e-5)

    # 4) Batch-folded Path B with the 2-block split (N=8, L=160 -> 1280 lanes).
    N3, L3 = 8, 160
    x3 = jax.random.normal(kx3, (N3, Cin, L3), dtype=jnp.float32)
    out3 = jax.block_until_ready(
        conv1d_forward(x3, weight, bias, min_pallas_elements=0))
    assert out3.shape == (N3, Cout, L3)
    assert jnp.allclose(out3, ref_fn(x3), atol=1e-5, rtol=1e-5)

    # 5) bf16 compute/output (halves HBM traffic); f32 MXU accumulation.
    out_bf16 = jax.block_until_ready(
        conv1d_forward(x2, weight, bias, compute_dtype=jnp.bfloat16,
                       out_dtype=jnp.bfloat16, min_pallas_elements=0))
    assert out_bf16.shape == (N, Cout, L2)
    assert jnp.allclose(out_bf16.astype(jnp.float32), ref_fn(x2),
                        atol=1e-1, rtol=1e-1)

    print("KERNEL_OK")
</pallas_src>

<mosaic_0001>
module attributes {stable_mosaic.version = 11 : i64} {
  func.func @_conv1d_kernel(%arg0: i32, %arg1: memref<4x128xf32, #tpu.memory_space<vmem>>, %arg2: memref<8x4xf32, #tpu.memory_space<vmem>>, %arg3: memref<8x1xf32, #tpu.memory_space<vmem>>, %arg4: memref<8x128xf32, #tpu.memory_space<vmem>>) attributes {dimension_semantics = [#tpu.dimension_semantics<parallel>], iteration_bounds = array<i64: 1>, scalar_prefetch = 0 : i64, scratch_operands = 0 : i64, tpu.core_type = #tpu.core_type<tc>, window_params = [{transform_indices = @transform_0, window_bounds = array<i64: 4, 128>}, {pipeline_mode = #tpu.pipeline_mode<synchronous>, transform_indices = @transform_1, window_bounds = array<i64: 8, 4>}, {pipeline_mode = #tpu.pipeline_mode<synchronous>, transform_indices = @transform_2, window_bounds = array<i64: 8, 1>}, {transform_indices = @transform_3, window_bounds = array<i64: 8, 128>}]} {
    %c0 = arith.constant 0 : index
    %c0_0 = arith.constant 0 : index
    %0 = vector.load %arg2[%c0, %c0_0] : memref<8x4xf32, #tpu.memory_space<vmem>>, vector<8x4xf32>
    %c0_1 = arith.constant 0 : index
    %c0_2 = arith.constant 0 : index
    %1 = vector.load %arg1[%c0_1, %c0_2] : memref<4x128xf32, #tpu.memory_space<vmem>>, vector<4x128xf32>
    %cst = arith.constant dense<0.000000e+00> : vector<8x128xf32>
    %2 = tpu.matmul %0, %1, %cst {dimension_numbers = #tpu.dot_dimension_numbers<[1], [0], [0], [1], [0, 0, 1, 1], [], []>} : vector<8x4xf32>, vector<4x128xf32>, vector<8x128xf32> -> vector<8x128xf32>
    %c0_3 = arith.constant 0 : index
    %c0_4 = arith.constant 0 : index
    %3 = vector.load %arg3[%c0_3, %c0_4] : memref<8x1xf32, #tpu.memory_space<vmem>>, vector<8x1xf32>
    %4 = vector.broadcast %3 : vector<8x1xf32> to vector<8x128xf32>
    %5 = arith.addf %2, %4 : vector<8x128xf32>
    %cst_5 = arith.constant 1.000000e-01 : f32
    %6 = vector.broadcast %cst_5 : f32 to vector<8x128xf32>
    %7 = arith.mulf %6, %5 : vector<8x128xf32>
    %8 = arith.maximumf %5, %7 : vector<8x128xf32>
    %c0_6 = arith.constant 0 : index
    %c0_7 = arith.constant 0 : index
    %9 = vector.load %arg4[%c0_6, %c0_7] : memref<8x128xf32, #tpu.memory_space<vmem>>, vector<8x128xf32>
    tpu.vector_store %arg4[%c0_6, %c0_7], %8 {strides = array<i32>} : memref<8x128xf32, #tpu.memory_space<vmem>>, vector<8x128xf32>,
    return
  }
  func.func @transform_0(%arg0: i32) -> (i32, i32) {
    %c0_i32 = arith.constant 0 : i32
    %c0_i32_0 = arith.constant 0 : i32
    return %c0_i32, %arg0 : i32, i32
  }
  func.func @transform_1(%arg0: i32) -> (i32, i32) {
    %c0_i32 = arith.constant 0 : i32
    %c0_i32_0 = arith.constant 0 : i32
    %c0_i32_1 = arith.constant 0 : i32
    return %c0_i32, %c0_i32_0 : i32, i32
  }
  func.func @transform_2(%arg0: i32) -> (i32, i32) {
    %c0_i32 = arith.constant 0 : i32
    %c0_i32_0 = arith.constant 0 : i32
    %c0_i32_1 = arith.constant 0 : i32
    return %c0_i32, %c0_i32_0 : i32, i32
  }
  func.func @transform_3(%arg0: i32) -> (i32, i32) {
    %c0_i32 = arith.constant 0 : i32
    %c0_i32_0 = arith.constant 0 : i32
    return %c0_i32, %arg0 : i32, i32
  }
}

</mosaic_0001>

<bundles_post_ra>
// kernel: tpu_custom_call.1
= control target key start
LH: loop header
LB: loop body
LE: loop exit
PB: predicated region body
PF: predicated region fallthrough
CT: control target
= control target key end

     0   :  { %vm27_vm0 = vcmask 1043456   ;;  %v154_v2 = vmov 0.0   ;;  %vm155_vm1 = vmmov 0   ;;  %vm23_vm2 = vcmask 31744   ;;  %s190_s0 = inlined_call_operand.vmem [shape: f32[4,128], index: 0, kind: input, shape index: {}]   ;;  %s191_s1 = inlined_call_operand.vmem [shape: f32[8,4], index: 1, kind: input, shape index: {}]   ;;  %s192_s2 = inlined_call_operand.vmem [shape: f32[8,1], index: 2, kind: input, shape index: {}]   ;;  %s193_s3 = inlined_call_operand.hbm [shape: f32[8,128], index: 3, kind: output, shape index: {}]  }
   0x1   :  { %v16_v0 = vld [vmem:[%s190_s0] sm:$0xf]  ;;  %122 = vmatprep.subr.mxu0 %v154_v2  ;;  %124 = vmatprep.mubr.msk.f32.mxu0 %vm155_vm1, %v154_v2 }
   0x2   :  { %v15_v1 = vld [vmem:[%s191_s1] sm:$0xff] }
   0x3   :  { %v17_v3 = vld [vmem:[%s192_s2] sm:$0xff] }
   0x4   :  { %8 = vsyncpa [#allocation3], 0  ;;  %123 = vmatpush3.msk.msra.mxu0 %vm27_vm0, %v16_v0  ;;  %v156_v4 = vmov 0   ;;  %s157_s0 = smov [#allocation2]  }
   0x5   :  { %131 = vset.pattern.permute.xlu0 %v156_v4  ;;  %125 = vmatmul.mubr.msk.f32.vlgmr.msra.gmra.mxu0 %vm23_vm2, %v15_v1  ;;  %s110_s1 = sshll.u32 %s157_s0, 4  ;;  %s111_s1 = int_to_ptr.vmem [resolvable:$true] %s110_s1 }
   0x6   :  { %20 = vperm.xlu0 %131, %v17_v3   ;;  %s132_s18 = scalar_lea.vmem %s111_s1, 128  ;;  %p137_p1 = scmp.lt.s32.totalorder %s111_s1, %s111_s1 }
   0x7   :  { %p133_p0 = scmp.ne.s32.totalorder %s111_s1, %s132_s18  ;;  %p138_p2 = scmp.lt.s32.totalorder %s132_s18, %s132_s18 }
   0x9   :  { %p139_p3 = por %p138_p2, %p137_p1 }
   0xb   :  { %p140_p4 = pnand %p139_p3, %p133_p0 }
  0x81   :  { %v21_v5 = vpop.permute.xlu0 %20 }
  0xc5   :  { %v97_v6 = vpop.f32.mrf.mxu0 }
  0xc6   :  { %v98_v7 = vadd.f32 %v97_v6, %v21_v5 }
  0xc7   :  { %v126_v8 = vpop.f32.mrf.mxu0 }
  0xc8   :  { %v101_v9 = vmul.f32 0.1, %v98_v7 }
  0xca   :  { %v102_v10 = vmax.f32 %v98_v7, %v101_v9 }
  0xcc   :  { %103 = vst [vmem:[#allocation2] sm:$0xff] %v102_v10 }
  0xcd   :  { %143 = shalt.err (!%p140_p4)
}
  0xce   :  { %113 = dma.vmem_to_hbm [thread:$0]  %s111_s1, 128, %s193_s3, [#allocation3]  }
  0xcf   :  { %152 = dma.done.wait [#allocation3], 128  }
  0xd0   :  { %153 = vsyncadd [#allocation3], 4294967168 }
  0xd1   :  { %117 = vsyncpa [#allocation3], 1 }

</bundles_post_ra>
